<compile_context>
chip_gen: v7x
topology: tpu7x:2x2x1
jax: 0.10.0
libtpu: 0.0.40
codegen_flags: <defaults>
</compile_context>

<pallas_src>
import jax
import jax.numpy as jnp
from jax.experimental import pallas as pl
from jax.experimental.pallas import tpu as pltpu


def _round_up(x, m):
    return ((x + m - 1) // m) * m


def _choose_batch_tiling(batch, e, in_bytes,
                         vmem_budget_bytes=12 * 1024 * 1024, tb_cap=8192):
    """Pick the lane (batch) tile TB and padded batch from a VMEM budget.

    Per lane column and grid step:
      * streamed [3E, TB] input slab, double-buffered        : 2 * 3E * in_bytes
      * f32 h1 / h2 intermediates (vregs or VMEM spill)      : 2 * E * 4
      * [1, TB] f32 output row (padded to 8 sublanes), x2    : 2 * 8 * 4
    Pinned weights are negligible at small E and excluded here.
    """
    b128 = _round_up(max(int(batch), 1), 128)
    per_col = 2 * 3 * e * in_bytes + 2 * e * 4 + 2 * 8 * 4
    tb = max(128, min(tb_cap, (vmem_budget_bytes // per_col) // 128 * 128))
    tb = min(tb, b128)

    steps = -(-b128 // tb)
    if steps == 1 and b128 >= 2 * 128:
        # Big enough to split: keep both v7x TensorCores busy.
        steps = 2
    elif steps > 1 and steps % 2:
        # Keep the "parallel" grid length even for v7x megacore sharding.
        steps += 1
    if steps > 1:
        tb = max(128, _round_up(-(-b128 // steps), 128))

    b_pad = tb * (-(-b128 // tb))
    return tb, b_pad


def mlp_kernel(x_ref, w1_ref, b1_ref, w2_ref, b2_ref, w3_ref, b3_ref, o_ref):
    """Fused 3-layer MLP on a transposed (batch-on-lanes) activation slab.

    x_ref  : [3E, TB]  packed [user; product; feature] embedding slab (bf16 or f32)
    w1_ref : [E, 3E]   fc1 weight, pre-transposed (out, in)
    w2_ref : [E, E]    fc2 weight, pre-transposed
    b1/b2  : [E, 1]    f32 bias columns
    w3_ref : [E, 1]    f32 fc3 weight column
    b3_ref : [1]       f32 scalar in SMEM
    o_ref  : [1, TB]   f32 output row (lane-dense)
    """
    # fc1: single K=3E MXU pass (accumulates inside the MXU, f32 result).
    h1 = jnp.dot(w1_ref[...], x_ref[...], preferred_element_type=jnp.float32)
    h1 = jnp.maximum(h1 + b1_ref[...], 0.0)
    # TODO(synk): nn.Dropout(0.2) is identity in eval mode; train-mode stochastic
    # dropout (pltpu.prng_seed + pltpu.stateful_bernoulli) intentionally omitted.

    # fc2
    h2 = jnp.dot(w2_ref[...], h1.astype(w2_ref.dtype),
                 preferred_element_type=jnp.float32)
    h2 = jnp.maximum(h2 + b2_ref[...], 0.0)

    # fc3 has a single output feature: VPU multiply + sublane (XLU) reduction
    # instead of a near-empty MXU pass; result is a lane-dense [1, TB] row.
    # Note: padded batch lanes hold bias-driven garbage here; the wrapper slices
    # them off before anything consumes the result.
    out = jnp.sum(h2 * w3_ref[...], axis=0, keepdims=True) + b3_ref[0]
    o_ref[...] = out.astype(o_ref.dtype)


def hybrid_mlp(x_t, w1_t, b1_c, w2_t, b2_c, w3_c, b3_s, *, tb):
    e3, b_pad = x_t.shape
    assert b_pad % tb == 0
    grid = (b_pad // tb,)

    def pinned(shape):
        # Constant block index -> stays VMEM-resident across batch tiles.
        # (For large E, add pipeline_mode=pl.Buffered(1) or DMA once into scratch.)
        return pl.BlockSpec(shape, lambda i: (0, 0))

    return pl.pallas_call(
        mlp_kernel,
        out_shape=jax.ShapeDtypeStruct((1, b_pad), jnp.float32),
        grid_spec=pltpu.PrefetchScalarGridSpec(
            num_scalar_prefetch=0,
            grid=grid,
            in_specs=[
                pl.BlockSpec((e3, tb), lambda i: (0, i)),   # streamed activation slab
                pinned(w1_t.shape),
                pinned(b1_c.shape),
                pinned(w2_t.shape),
                pinned(b2_c.shape),
                pinned(w3_c.shape),
                pl.BlockSpec(memory_space=pltpu.MemorySpace.SMEM),
            ],
            out_specs=pl.BlockSpec((1, tb), lambda i: (0, i)),
        ),
        compiler_params=pltpu.CompilerParams(
            dimension_semantics=("parallel",),
            vmem_limit_bytes=32 * 1024 * 1024,
        ),
    )(x_t, w1_t, b1_c, w2_t, b2_c, w3_c, b3_s)


def prepare_hybrid_params(user_table, product_table, w1, b1, w2, b2, w3, b3,
                          compute_dtype=jnp.bfloat16):
    """One-time weight prep (transpose / cast / reshape), hoisted out of the
    per-call serving path.  Weights use the y = x @ W + b convention
    (W is [in, out]); the kernel consumes the pre-transposed [out, in] form."""
    E = user_table.shape[1]
    return dict(
        user_table=user_table,
        product_table=product_table,
        w1_t=w1.T.astype(compute_dtype),               # [E, 3E]
        w2_t=w2.T.astype(compute_dtype),               # [E, E]
        b1_c=b1.reshape(E, 1).astype(jnp.float32),
        b2_c=b2.reshape(E, 1).astype(jnp.float32),
        w3_c=w3.reshape(E, 1).astype(jnp.float32),
        b3_s=b3.reshape(1).astype(jnp.float32),
    )


def hybrid_model_forward(params, user_ids, product_ids, feature_embeds):
    """Embedding lookups (XLA gather glue) + fused Pallas MLP."""
    E = params["user_table"].shape[1]
    B = user_ids.shape[0]
    cdt = params["w1_t"].dtype
    tb, b_pad = _choose_batch_tiling(B, E, jnp.dtype(cdt).itemsize)
    pad = b_pad - B

    # TODO(synk): the gathers could be fused into the kernel via scalar-prefetched
    # ids + per-row DMA; at small E the per-row DMAs are tiny, so they are kept as
    # XLA gathers.  Everything below is one producer fusion writing the single
    # [3E, b_pad] slab the kernel streams (no separate transpose round trip of
    # three f32 slabs as before, and bf16 halves the traffic).
    ue = jnp.take(params["user_table"], user_ids, axis=0)        # [B, E]
    pe = jnp.take(params["product_table"], product_ids, axis=0)  # [B, E]
    x = jnp.concatenate([ue, pe, feature_embeds], axis=1)        # [B, 3E]
    x_t = x.astype(cdt).T                                        # [3E, B]
    if pad:
        x_t = jnp.pad(x_t, ((0, 0), (0, pad)))                   # [3E, b_pad]

    out = hybrid_mlp(x_t,
                     params["w1_t"], params["b1_c"],
                     params["w2_t"], params["b2_c"],
                     params["w3_c"], params["b3_s"], tb=tb)      # [1, b_pad]
    return out[0, :B]                                            # [B]


if __name__ == "__main__":
    key = jax.random.PRNGKey(0)

    # Small synthetic config consistent with the module's __init__.
    num_users = 16
    num_products = 16
    E = 32            # sentence-embedding dimension
    B = 8             # batch size

    keys = jax.random.split(key, 10)
    user_table = jax.random.normal(keys[0], (num_users, E), jnp.float32) * 0.1
    product_table = jax.random.normal(keys[1], (num_products, E), jnp.float32) * 0.1

    # fc1: Linear(3E, E), fc2: Linear(E, E), fc3: Linear(E, 1)  (y = x @ W + b)
    w1 = jax.random.normal(keys[2], (3 * E, E), jnp.float32) * 0.05
    b1 = jax.random.normal(keys[3], (E,), jnp.float32) * 0.01
    w2 = jax.random.normal(keys[4], (E, E), jnp.float32) * 0.05
    b2 = jax.random.normal(keys[5], (E,), jnp.float32) * 0.01
    w3 = jax.random.normal(keys[6], (E, 1), jnp.float32) * 0.05
    b3 = jax.random.normal(keys[7], (1,), jnp.float32) * 0.01

    user_ids = jax.random.randint(keys[8], (B,), 0, num_users)
    product_ids = jax.random.randint(keys[9], (B,), 0, num_products)
    # Stand-in for SentenceTransformer.encode(features) output.
    feature_embeds = jax.random.normal(jax.random.PRNGKey(42), (B, E), jnp.float32)

    # Pure-JAX reference.
    ue = jnp.take(user_table, user_ids, axis=0)
    pe = jnp.take(product_table, product_ids, axis=0)
    x = jnp.concatenate([ue, pe, feature_embeds], axis=1)
    ref = jnp.maximum(x @ w1 + b1, 0.0)
    ref = jnp.maximum(ref @ w2 + b2, 0.0)
    ref = (ref @ w3 + b3).reshape(-1)

    forward = jax.jit(hybrid_model_forward)

    # f32 path (strict check).
    params_f32 = prepare_hybrid_params(user_table, product_table,
                                       w1, b1, w2, b2, w3, b3,
                                       compute_dtype=jnp.float32)
    out_f32 = forward(params_f32, user_ids, product_ids, feature_embeds)
    out_f32 = jax.block_until_ready(out_f32)
    assert out_f32.shape == (B,)
    assert jnp.allclose(out_f32, ref, atol=1e-5, rtol=1e-5)

    # Default serving path: bf16 MXU operands / streamed slab, f32 accumulation.
    params_bf16 = prepare_hybrid_params(user_table, product_table,
                                        w1, b1, w2, b2, w3, b3,
                                        compute_dtype=jnp.bfloat16)
    out_bf16 = forward(params_bf16, user_ids, product_ids, feature_embeds)
    out_bf16 = jax.block_until_ready(out_bf16)
    assert out_bf16.shape == (B,)
    assert jnp.allclose(out_bf16, ref, atol=5e-3, rtol=5e-2)

    print("KERNEL_OK")
</pallas_src>

<mosaic_0001>
module attributes {stable_mosaic.version = 11 : i64} {
  func.func @mlp_kernel(%arg0: i32, %arg1: memref<96x128xf32, #tpu.memory_space<vmem>>, %arg2: memref<32x96xf32, #tpu.memory_space<vmem>>, %arg3: memref<32x1xf32, #tpu.memory_space<vmem>>, %arg4: memref<32x32xf32, #tpu.memory_space<vmem>>, %arg5: memref<32x1xf32, #tpu.memory_space<vmem>>, %arg6: memref<32x1xf32, #tpu.memory_space<vmem>>, %arg7: memref<1xf32, #tpu.memory_space<smem>>, %arg8: memref<1x128xf32, #tpu.memory_space<vmem>>) attributes {dimension_semantics = [#tpu.dimension_semantics<parallel>], iteration_bounds = array<i64: 1>, scalar_prefetch = 0 : i64, scratch_operands = 0 : i64, tpu.core_type = #tpu.core_type<tc>, window_params = [{transform_indices = @transform_0, window_bounds = array<i64: 96, 128>}, {pipeline_mode = #tpu.pipeline_mode<synchronous>, transform_indices = @transform_1, window_bounds = array<i64: 32, 96>}, {pipeline_mode = #tpu.pipeline_mode<synchronous>, transform_indices = @transform_2, window_bounds = array<i64: 32, 1>}, {pipeline_mode = #tpu.pipeline_mode<synchronous>, transform_indices = @transform_3, window_bounds = array<i64: 32, 32>}, {pipeline_mode = #tpu.pipeline_mode<synchronous>, transform_indices = @transform_4, window_bounds = array<i64: 32, 1>}, {pipeline_mode = #tpu.pipeline_mode<synchronous>, transform_indices = @transform_5, window_bounds = array<i64: 32, 1>}, {transform_indices = @transform_6, window_bounds = array<i64: 1>}, {transform_indices = @transform_7, window_bounds = array<i64: 1, 128>}]} {
    %c0 = arith.constant 0 : index
    %c0_0 = arith.constant 0 : index
    %0 = vector.load %arg2[%c0, %c0_0] : memref<32x96xf32, #tpu.memory_space<vmem>>, vector<32x96xf32>
    %c0_1 = arith.constant 0 : index
    %c0_2 = arith.constant 0 : index
    %1 = vector.load %arg1[%c0_1, %c0_2] : memref<96x128xf32, #tpu.memory_space<vmem>>, vector<96x128xf32>
    %cst = arith.constant dense<0.000000e+00> : vector<32x128xf32>
    %2 = tpu.matmul %0, %1, %cst {dimension_numbers = #tpu.dot_dimension_numbers<[1], [0], [0], [1], [0, 0, 1, 1], [], []>} : vector<32x96xf32>, vector<96x128xf32>, vector<32x128xf32> -> vector<32x128xf32>
    %c0_3 = arith.constant 0 : index
    %c0_4 = arith.constant 0 : index
    %3 = vector.load %arg3[%c0_3, %c0_4] : memref<32x1xf32, #tpu.memory_space<vmem>>, vector<32x1xf32>
    %4 = vector.broadcast %3 : vector<32x1xf32> to vector<32x128xf32>
    %5 = arith.addf %2, %4 : vector<32x128xf32>
    %cst_5 = arith.constant 0.000000e+00 : f32
    %6 = vector.broadcast %cst_5 : f32 to vector<32x128xf32>
    %7 = arith.maximumf %5, %6 : vector<32x128xf32>
    %c0_6 = arith.constant 0 : index
    %c0_7 = arith.constant 0 : index
    %8 = vector.load %arg4[%c0_6, %c0_7] : memref<32x32xf32, #tpu.memory_space<vmem>>, vector<32x32xf32>
    %cst_8 = arith.constant dense<0.000000e+00> : vector<32x128xf32>
    %9 = tpu.matmul %8, %7, %cst_8 {dimension_numbers = #tpu.dot_dimension_numbers<[1], [0], [0], [1], [0, 0, 1, 1], [], []>} : vector<32x32xf32>, vector<32x128xf32>, vector<32x128xf32> -> vector<32x128xf32>
    %c0_9 = arith.constant 0 : index
    %c0_10 = arith.constant 0 : index
    %10 = vector.load %arg5[%c0_9, %c0_10] : memref<32x1xf32, #tpu.memory_space<vmem>>, vector<32x1xf32>
    %11 = vector.broadcast %10 : vector<32x1xf32> to vector<32x128xf32>
    %12 = arith.addf %9, %11 : vector<32x128xf32>
    %cst_11 = arith.constant 0.000000e+00 : f32
    %13 = vector.broadcast %cst_11 : f32 to vector<32x128xf32>
    %14 = arith.maximumf %12, %13 : vector<32x128xf32>
    %c0_12 = arith.constant 0 : index
    %c0_13 = arith.constant 0 : index
    %15 = vector.load %arg6[%c0_12, %c0_13] : memref<32x1xf32, #tpu.memory_space<vmem>>, vector<32x1xf32>
    %16 = vector.broadcast %15 : vector<32x1xf32> to vector<32x128xf32>
    %17 = arith.mulf %14, %16 : vector<32x128xf32>
    %cst_14 = arith.constant dense<0.000000e+00> : vector<128xf32>
    %18 = vector.multi_reduction <add>, %17, %cst_14 [0] : vector<32x128xf32> to vector<128xf32>
    %19 = vector.shape_cast %18 : vector<128xf32> to vector<1x128xf32>
    %c0_15 = arith.constant 0 : index
    %20 = memref.load %arg7[%c0_15] : memref<1xf32, #tpu.memory_space<smem>>
    %21 = vector.broadcast %20 : f32 to vector<1x128xf32>
    %22 = arith.addf %19, %21 : vector<1x128xf32>
    %c0_16 = arith.constant 0 : index
    %c0_17 = arith.constant 0 : index
    %23 = vector.load %arg8[%c0_16, %c0_17] : memref<1x128xf32, #tpu.memory_space<vmem>>, vector<1x128xf32>
    tpu.vector_store %arg8[%c0_16, %c0_17], %22 {strides = array<i32>} : memref<1x128xf32, #tpu.memory_space<vmem>>, vector<1x128xf32>,
    return
  }
  func.func @transform_0(%arg0: i32) -> (i32, i32) {
    %c0_i32 = arith.constant 0 : i32
    %c0_i32_0 = arith.constant 0 : i32
    return %c0_i32, %arg0 : i32, i32
  }
  func.func @transform_1(%arg0: i32) -> (i32, i32) {
    %c0_i32 = arith.constant 0 : i32
    %c0_i32_0 = arith.constant 0 : i32
    %c0_i32_1 = arith.constant 0 : i32
    return %c0_i32, %c0_i32_0 : i32, i32
  }
  func.func @transform_2(%arg0: i32) -> (i32, i32) {
    %c0_i32 = arith.constant 0 : i32
    %c0_i32_0 = arith.constant 0 : i32
    %c0_i32_1 = arith.constant 0 : i32
    return %c0_i32, %c0_i32_0 : i32, i32
  }
  func.func @transform_3(%arg0: i32) -> (i32, i32) {
    %c0_i32 = arith.constant 0 : i32
    %c0_i32_0 = arith.constant 0 : i32
    %c0_i32_1 = arith.constant 0 : i32
    return %c0_i32, %c0_i32_0 : i32, i32
  }
  func.func @transform_4(%arg0: i32) -> (i32, i32) {
    %c0_i32 = arith.constant 0 : i32
    %c0_i32_0 = arith.constant 0 : i32
    %c0_i32_1 = arith.constant 0 : i32
    return %c0_i32, %c0_i32_0 : i32, i32
  }
  func.func @transform_5(%arg0: i32) -> (i32, i32) {
    %c0_i32 = arith.constant 0 : i32
    %c0_i32_0 = arith.constant 0 : i32
    %c0_i32_1 = arith.constant 0 : i32
    return %c0_i32, %c0_i32_0 : i32, i32
  }
  func.func @transform_6(%arg0: i32) -> i32 {
    %c0_i32 = arith.constant 0 : i32
    %c0_i32_0 = arith.constant 0 : i32
    return %c0_i32 : i32
  }
  func.func @transform_7(%arg0: i32) -> (i32, i32) {
    %c0_i32 = arith.constant 0 : i32
    %c0_i32_0 = arith.constant 0 : i32
    return %c0_i32, %arg0 : i32, i32
  }
}

</mosaic_0001>

<bundles_post_ra>
// kernel: hybrid_model_forward.1
= control target key start
LH: loop header
LB: loop body
LE: loop exit
PB: predicated region body
PF: predicated region fallthrough
CT: control target
= control target key end

     0   :  { %v455_v3 = vmov 0   ;;  %vm67_vm0 = vcmask 785408   ;;  %vm197_vm1 = vcmask 261120   ;;  %s606_s0 = inlined_call_operand.vmem [shape: f32[96,128], index: 0, kind: input, shape index: {}]   ;;  %s607_s1 = inlined_call_operand.vmem [shape: f32[32,96], index: 1, kind: input, shape index: {}]   ;;  %s608_s2 = inlined_call_operand.vmem [shape: f32[32,1], index: 2, kind: input, shape index: {}]   ;;  %s609_s4 = inlined_call_operand.vmem [shape: f32[32,1], index: 4, kind: input, shape index: {}]   ;;  %s610_s5 = inlined_call_operand.vmem [shape: f32[32,1], index: 5, kind: input, shape index: {}]   ;;  %s611_s3 = inlined_call_operand.vmem [shape: f32[32,32], index: 3, kind: input, shape index: {}]   ;;  %s612_s6 = inlined_call_operand.<no memory space> [shape: f32[1], index: 6, kind: input, shape index: {}]   ;;  %s613_s7 = inlined_call_operand.vmem [shape: f32[1,128], index: 7, kind: output, shape index: {}]  }
   0x1   :  { %v31_v0 = vld [vmem:[%s606_s0] sm:$0xff]  ;;  %v32_v1 = vld [vmem:[%s606_s0 + $0x8] sm:$0xff]  ;;  %v33_v2 = vld [vmem:[%s606_s0 + $0x10] sm:$0xff]  ;;  %453 = vset.pattern.permute.xlu0 %v455_v3  ;;  %454 = vset.pattern.permute.xlu1 %v455_v3 }
   0x2   :  { %v420_v4 = vpack.c.bf16 %v32_v1, %v31_v0  ;;  %v34_v5 = vld [vmem:[%s606_s0 + $0x18] sm:$0xff]  ;;  %v35_v7 = vld [vmem:[%s606_s0 + $0x20] sm:$0xff]  ;;  %v36_v8 = vld [vmem:[%s606_s0 + $0x28] sm:$0xff] }
   0x3   :  { %v424_v6 = vpack.c.bf16 %v34_v5, %v33_v2  ;;  %v27_v9 = vld [vmem:[%s607_s1] sm:$0xff]  ;;  %v428_v10 = vpack.c.bf16 %v36_v8, %v35_v7  ;;  %v45_v12 = vld [vmem:[%s608_s2 + $0x10] sm:$0xff]  ;;  %v38_v14 = vld [vmem:[%s606_s0 + $0x38] sm:$0xff] }
   0x4   :  { %421 = vmatprep.subr.bf16.mxu0 %v420_v4  ;;  %400 = vmatprep.mubr.msk.f32.mxu0 %vm67_vm0, %v27_v9  ;;  %v43_v11 = vld [vmem:[%s608_s2] sm:$0xff]  ;;  %v37_v13 = vld [vmem:[%s606_s0 + $0x30] sm:$0xff]  ;;  %v44_v15 = vld [vmem:[%s608_s2 + $0x8] sm:$0xff] }
   0x5   :  { %423 = vmatpush3.bf16.msra.mxu0 %v420_v4  ;;  %49 = vperm.xlu0 %453, %v43_v11   ;;  %v46_v16 = vld [vmem:[%s608_s2 + $0x18] sm:$0xff]  ;;  %v432_v17 = vpack.c.bf16 %v38_v14, %v37_v13  ;;  %v39_v18 = vld [vmem:[%s606_s0 + $0x40] sm:$0xff]  ;;  %v40_v19 = vld [vmem:[%s606_s0 + $0x48] sm:$0xff] }
   0x6   :  { %425 = vmatprep.subr.bf16.mxu0 %v424_v6  ;;  %59 = vperm.xlu1 %454, %v45_v12   ;;  %v173_v20 = vld [vmem:[%s609_s4] sm:$0xff]  ;;  %v174_v21 = vld [vmem:[%s609_s4 + $0x8] sm:$0xff]  ;;  %v436_v22 = vpack.c.bf16 %v40_v19, %v39_v18  ;;  %v41_v23 = vld [vmem:[%s606_s0 + $0x50] sm:$0xff] }
   0x7   :  { %v42_v24 = vld [vmem:[%s606_s0 + $0x58] sm:$0xff]  ;;  %v175_v25 = vld [vmem:[%s609_s4 + $0x10] sm:$0xff]  ;;  %v299_v28 = vld [vmem:[%s610_s5] sm:$0xff] }
   0x8   :  { %v176_v26 = vld [vmem:[%s609_s4 + $0x18] sm:$0xff]  ;;  %v440_v27 = vpack.c.bf16 %v42_v24, %v41_v23  ;;  %v300_v29 = vld [vmem:[%s610_s5 + $0x8] sm:$0xff]  ;;  %v301_v30 = vld [vmem:[%s610_s5 + $0x10] sm:$0xff] }
   0x9   :  { %427 = vmatpush3.bf16.msra.mxu0 %v424_v6  ;;  %54 = vperm.xlu0 %453, %v44_v15   ;;  %v302_v31 = vld [vmem:[%s610_s5 + $0x18] sm:$0xff]  ;;  %v28_v32 = vld [vmem:[%s607_s1 + $0x8] sm:$0xff]  ;;  %v29_v33 = vld [vmem:[%s607_s1 + $0x10] sm:$0xff] }
   0xa   :  { %429 = vmatprep.subr.bf16.mxu0 %v428_v10  ;;  %64 = vperm.xlu1 %454, %v46_v16   ;;  %v30_v34 = vld [vmem:[%s607_s1 + $0x18] sm:$0xff]  ;;  %v169_v35 = vld [vmem:[%s611_s3] sm:$0xff]  ;;  %v170_v54 = vld [vmem:[%s611_s3 + $0x8] sm:$0xff] }
   0xb   :  { %414 = vmatprep.mubr.msk.f32.mxu1 %vm197_vm1, %v169_v35  ;;  %v171_v55 = vld [vmem:[%s611_s3 + $0x10] sm:$0xff]  ;;  %v172_v56 = vld [vmem:[%s611_s3 + $0x18] sm:$0xff] }
   0xd   :  { %431 = vmatpush3.bf16.msra.mxu0 %v428_v10  ;;  %179 = vperm.xlu0 %453, %v173_v20  }
   0xe   :  { %433 = vmatprep.subr.bf16.mxu0 %v432_v17  ;;  %184 = vperm.xlu1 %454, %v174_v21  }
  0x11   :  { %435 = vmatpush3.bf16.msra.mxu0 %v432_v17  ;;  %189 = vperm.xlu0 %453, %v175_v25   ;;  %v337_v25 = vstv %s612_s6 }
  0x12   :  { %437 = vmatprep.subr.bf16.mxu0 %v436_v22  ;;  %194 = vperm.xlu1 %454, %v176_v26  }
  0x15   :  { %439 = vmatpush3.bf16.msra.mxu0 %v436_v22  ;;  %305 = vperm.xlu0 %453, %v299_v28  }
  0x16   :  { %441 = vmatprep.subr.bf16.mxu0 %v440_v27  ;;  %310 = vperm.xlu1 %454, %v300_v29  }
  0x19   :  { %443 = vmatpush3.bf16.msra.mxu0 %v440_v27  ;;  %315 = vperm.xlu0 %453, %v301_v30  }
  0x1a   :  { %320 = vperm.xlu1 %454, %v302_v31  }
  0x1c   :  { %401 = vmatmul.mubr.msk.f32.vlgmr.msra.gmra.mrb[0].mxu0 %vm67_vm0, %v28_v32 }
  0x1d   :  { %403 = vmatprep.mubr.msk.f32.mxu0 %vm67_vm0, %v29_v33 }
  0x20   :  { %404 = vmatmul.mubr.msk.f32.gmra.mrb[2].mxu0 %vm67_vm0, %v30_v34 }
  0x84   :  { %v50_v36 = vpop.permute.xlu0 %49 }
  0x85   :  { %v60_v37 = vpop.permute.xlu1 %59 }
  0x88   :  { %v55_v38 = vpop.permute.xlu0 %54 }
  0x89   :  { %v65_v44 = vpop.permute.xlu1 %64 }
  0x8c   :  { %v180_v57 = vpop.permute.xlu0 %179 }
  0x8d   :  { %v185_v58 = vpop.permute.xlu1 %184 }
  0x90   :  { %v190_v59 = vpop.permute.xlu0 %189 }
  0x91   :  { %v195_v60 = vpop.permute.xlu1 %194 }
  0x94   :  { %v306_v1 = vpop.permute.xlu0 %305 }
  0x95   :  { %v311_v3 = vpop.permute.xlu1 %310 }
  0x98   :  { %v316_v14 = vpop.permute.xlu0 %315 }
  0x99   :  { %v321_v16 = vpop.permute.xlu1 %320 }
  0xef   :  { %v402_v39 = vpop.f32.mrb[0].mxu0 }
  0xf0   :  { %v152_v40 = vadd.f32 %v402_v39, %v55_v38  ;;  %v146_v41 = vpop.f32.mrb[1].mxu0 }
  0xf1   :  { %v147_v42 = vadd.f32 %v146_v41, %v50_v36 }
  0xf2   :  { %v166_v43 = vmax.f32 %v152_v40, 0.0 }
  0xf3   :  { %v165_v45 = vmax.f32 %v147_v42, 0.0  ;;  %v405_v46 = vpop.f32.mrb[2].mxu0 }
  0xf4   :  { %v162_v47 = vadd.f32 %v405_v46, %v65_v44  ;;  %v156_v48 = vpop.f32.mrb[3].mxu0 }
  0xf5   :  { %v157_v49 = vadd.f32 %v156_v48, %v60_v37  ;;  %v444_v50 = vpack.c.bf16 %v166_v43, %v165_v45 }
  0xf6   :  { %v168_v51 = vmax.f32 %v162_v47, 0.0 }
  0xf7   :  { %v167_v52 = vmax.f32 %v157_v49, 0.0  ;;  %445 = vmatprep.subr.bf16.mxu1 %v444_v50 }
  0xf8   :  { %447 = vmatpush3.bf16.msra.mxu1 %v444_v50 }
  0xf9   :  { %v448_v53 = vpack.c.bf16 %v168_v51, %v167_v52 }
  0xfb   :  { %449 = vmatprep.subr.bf16.mxu1 %v448_v53 }
  0xfc   :  { %451 = vmatpush3.bf16.msra.mxu1 %v448_v53 }
  0xff   :  { %415 = vmatmul.mubr.msk.f32.vlgmr.msra.gmra.mrb[0].mxu1 %vm197_vm1, %v170_v54 }
 0x100   :  { %417 = vmatprep.mubr.msk.f32.mxu1 %vm197_vm1, %v171_v55 }
 0x103   :  { %418 = vmatmul.mubr.msk.f32.gmra.mrb[2].mxu1 %vm197_vm1, %v172_v56 }
 0x1d2   :  { %v416_v61 = vpop.f32.mrb[0].mxu1 }
 0x1d3   :  { %v282_v62 = vadd.f32 %v416_v61, %v185_v58  ;;  %v276_v63 = vpop.f32.mrb[1].mxu1 }
 0x1d4   :  { %v277_v0 = vadd.f32 %v276_v63, %v180_v57 }
 0x1d5   :  { %v296_v2 = vmax.f32 %v282_v62, 0.0 }
 0x1d6   :  { %v295_v4 = vmax.f32 %v277_v0, 0.0  ;;  %v419_v5 = vpop.f32.mrb[2].mxu1 }
 0x1d7   :  { %v324_v6 = vmul.f32 %v311_v3, %v296_v2  ;;  %v292_v7 = vadd.f32 %v419_v5, %v195_v60  ;;  %v286_v8 = vpop.f32.mrb[3].mxu1 }
 0x1d8   :  { %v323_v9 = vmul.f32 %v306_v1, %v295_v4  ;;  %v287_v10 = vadd.f32 %v286_v8, %v190_v59 }
 0x1d9   :  { %v298_v12 = vmax.f32 %v292_v7, 0.0 }
 0x1da   :  { %v327_v11 = vadd.f32 %v324_v6, %v323_v9  ;;  %v297_v13 = vmax.f32 %v287_v10, 0.0 }
 0x1db   :  { %v326_v17 = vmul.f32 %v321_v16, %v298_v12 }
 0x1dc   :  { %v325_v15 = vmul.f32 %v316_v14, %v297_v13 }
 0x1de   :  { %v328_v18 = vadd.f32 %v327_v11, %v325_v15 }
 0x1e0   :  { %v329_v19 = vadd.f32 %v328_v18, %v326_v17 }
 0x1e2   :  { %v330_v20 = vrot.slane %v329_v19, 4 }
 0x1e4   :  { %v331_v21 = vadd.f32 %v330_v20, %v329_v19 }
 0x1e6   :  { %v332_v22 = vrot.slane %v331_v21, 2 }
 0x1e8   :  { %v333_v23 = vadd.f32 %v332_v22, %v331_v21 }
 0x1ea   :  { %v334_v24 = vrot.slane %v333_v23, 1 }
 0x1ec   :  { %v335_v26 = vadd.f32 %v334_v24, %v333_v23 }
 0x1ee   :  { %v338_v27 = vadd.f32 %v337_v25, %v335_v26 }
 0x1f0   :  { %339 = vst [vmem:[%s613_s7] sm:$0x1] %v338_v27 }

</bundles_post_ra>
